<compile_context>
chip_gen: v5e
topology: v5e:2x2
jax: 0.10.0
libtpu: 0.0.40
codegen_flags: <defaults>
</compile_context>

<pallas_src>
import jax
import jax.numpy as jnp
from jax.experimental import pallas as pl
from jax.experimental.pallas import tpu as pltpu


def _round_up(n, m):
    return ((n + m - 1) // m) * m


def net_continuous_kernel(x_ref, w1_ref, b1_ref, w2_ref, b2_ref, mu_ref):
    # hidden = relu(x @ W1 + b1)            (MXU matmul + VPU max)
    h = jnp.dot(x_ref[...], w1_ref[...], preferred_element_type=jnp.float32)
    h = jnp.maximum(h + b1_ref[...], 0.0)
    # mu = tanh(hidden @ W2 + b2)           (MXU matmul + EUP tanh)
    z = jnp.dot(h, w2_ref[...], preferred_element_type=jnp.float32)
    mu_ref[...] = jnp.tanh(z + b2_ref[...])


def net_continuous_forward(x, w1, b1, w2, b2, action_log_std):
    """Pallas forward pass of Net_Continuous.

    x              : [B, input_dim]      float32
    w1             : [input_dim, hidden] float32  (nn.Linear weight, transposed)
    b1             : [1, hidden]         float32
    w2             : [hidden, output]    float32  (nn.Linear weight, transposed)
    b2             : [1, output]         float32
    action_log_std : [1, output]         float32
    returns (mu [B, output], action_log_std broadcast to [B, output])
    """
    B, input_dim = x.shape
    hidden = w1.shape[1]
    out_dim = w2.shape[1]

    # Lane-dense output: pad out columns to a multiple of 128.
    out_pad = _round_up(max(out_dim, 128), 128)
    # Batch tile: big enough to saturate HBM pipelining, small enough for
    # v7x's 64 MiB VMEM with double-buffered x/mu tiles; divisible by 8.
    tb = min(512, _round_up(B, 8))
    b_pad = _round_up(B, tb)

    x_p = x if b_pad == B else jnp.pad(x, ((0, b_pad - B), (0, 0)))
    w2_p = jnp.pad(w2, ((0, 0), (0, out_pad - out_dim)))
    b2_p = jnp.pad(b2, ((0, 0), (0, out_pad - out_dim)))

    flops = 2 * b_pad * (input_dim * hidden + hidden * out_pad)
    transcendentals = b_pad * out_pad  # tanh
    bytes_accessed = 4 * (x_p.size + w1.size + b1.size + w2_p.size + b2_p.size
                          + b_pad * out_pad)

    mu_padded = pl.pallas_call(
        net_continuous_kernel,
        out_shape=jax.ShapeDtypeStruct((b_pad, out_pad), jnp.float32),
        grid=(b_pad // tb,),
        in_specs=[
            pl.BlockSpec((tb, input_dim), lambda i: (i, 0)),     # x: batch-tiled
            pl.BlockSpec((input_dim, hidden), lambda i: (0, 0)),  # w1: resident
            pl.BlockSpec((1, hidden), lambda i: (0, 0)),          # b1: resident
            pl.BlockSpec((hidden, out_pad), lambda i: (0, 0)),    # w2: resident
            pl.BlockSpec((1, out_pad), lambda i: (0, 0)),         # b2: resident
        ],
        out_specs=pl.BlockSpec((tb, out_pad), lambda i: (i, 0)),  # mu: lane-dense
        compiler_params=pltpu.CompilerParams(
            dimension_semantics=("parallel",)),
        cost_estimate=pl.CostEstimate(
            flops=flops,
            transcendentals=transcendentals,
            bytes_accessed=bytes_accessed),
    )(x_p, w1, b1, w2_p, b2_p)

    mu = mu_padded[:B, :out_dim]
    # action_log_std.expand_as(mu): pure broadcast, done outside the kernel.
    log_std = jnp.broadcast_to(action_log_std, mu.shape)
    return mu, log_std


def init_params(key, input_dim, hidden_dim, output_dim):
    """Deterministic init matching nn.Linear's uniform(-1/sqrt(fan_in), +1/sqrt(fan_in))."""
    k1, k2, k3, k4 = jax.random.split(key, 4)
    lim1 = 1.0 / jnp.sqrt(jnp.float32(input_dim))
    lim2 = 1.0 / jnp.sqrt(jnp.float32(hidden_dim))
    # stored transposed: [in, out]
    w1 = jax.random.uniform(k1, (input_dim, hidden_dim), jnp.float32, -lim1, lim1)
    b1 = jax.random.uniform(k2, (1, hidden_dim), jnp.float32, -lim1, lim1)
    w2 = jax.random.uniform(k3, (hidden_dim, output_dim), jnp.float32, -lim2, lim2)
    b2 = jax.random.uniform(k4, (1, output_dim), jnp.float32, -lim2, lim2)
    # self.action_log_std = nn.Parameter(torch.zeros(1, output_dim) - 2)
    action_log_std = jnp.zeros((1, output_dim), jnp.float32) - 2.0
    return w1, b1, w2, b2, action_log_std


if __name__ == "__main__":
    key = jax.random.PRNGKey(0)
    batch, input_dim, hidden_dim, output_dim = 8, 16, 32, 4

    kx, kp = jax.random.split(key)
    x = jax.random.normal(kx, (batch, input_dim), jnp.float32)
    w1, b1, w2, b2, als = init_params(kp, input_dim, hidden_dim, output_dim)

    mu, log_std = net_continuous_forward(x, w1, b1, w2, b2, als)
    jax.block_until_ready((mu, log_std))

    # pure-JAX reference check
    ref_h = jnp.maximum(x @ w1 + b1, 0.0)
    ref_mu = jnp.tanh(ref_h @ w2 + b2)
    ref_ls = jnp.broadcast_to(als, ref_mu.shape)
    assert mu.shape == ref_mu.shape and log_std.shape == ref_ls.shape
    assert jnp.allclose(mu, ref_mu, atol=1e-5, rtol=1e-5)
    assert jnp.allclose(log_std, ref_ls)

    # second shape (batch not a multiple of the tile) to exercise padding path
    x2 = jax.random.normal(kx, (13, input_dim), jnp.float32)
    mu2, ls2 = net_continuous_forward(x2, w1, b1, w2, b2, als)
    jax.block_until_ready((mu2, ls2))
    ref_mu2 = jnp.tanh(jnp.maximum(x2 @ w1 + b1, 0.0) @ w2 + b2)
    assert jnp.allclose(mu2, ref_mu2, atol=1e-5, rtol=1e-5)
    assert jnp.allclose(ls2, jnp.broadcast_to(als, ref_mu2.shape))

    print("KERNEL_OK")
</pallas_src>

<mosaic_0001>
module attributes {stable_mosaic.version = 11 : i64} {
  func.func @net_continuous_kernel(%arg0: i32, %arg1: memref<8x16xf32, #tpu.memory_space<vmem>>, %arg2: memref<16x32xf32, #tpu.memory_space<vmem>>, %arg3: memref<1x32xf32, #tpu.memory_space<vmem>>, %arg4: memref<32x128xf32, #tpu.memory_space<vmem>>, %arg5: memref<1x128xf32, #tpu.memory_space<vmem>>, %arg6: memref<8x128xf32, #tpu.memory_space<vmem>>) attributes {dimension_semantics = [#tpu.dimension_semantics<parallel>], iteration_bounds = array<i64: 1>, scalar_prefetch = 0 : i64, scratch_operands = 0 : i64, tpu.core_type = #tpu.core_type<tc>, window_params = [{transform_indices = @transform_0, window_bounds = array<i64: 8, 16>}, {pipeline_mode = #tpu.pipeline_mode<synchronous>, transform_indices = @transform_1, window_bounds = array<i64: 16, 32>}, {pipeline_mode = #tpu.pipeline_mode<synchronous>, transform_indices = @transform_2, window_bounds = array<i64: 1, 32>}, {pipeline_mode = #tpu.pipeline_mode<synchronous>, transform_indices = @transform_3, window_bounds = array<i64: 32, 128>}, {pipeline_mode = #tpu.pipeline_mode<synchronous>, transform_indices = @transform_4, window_bounds = array<i64: 1, 128>}, {transform_indices = @transform_5, window_bounds = array<i64: 8, 128>}]} {
    %c0 = arith.constant 0 : index
    %c0_0 = arith.constant 0 : index
    %0 = vector.load %arg1[%c0, %c0_0] : memref<8x16xf32, #tpu.memory_space<vmem>>, vector<8x16xf32>
    %c0_1 = arith.constant 0 : index
    %c0_2 = arith.constant 0 : index
    %1 = vector.load %arg2[%c0_1, %c0_2] : memref<16x32xf32, #tpu.memory_space<vmem>>, vector<16x32xf32>
    %cst = arith.constant dense<0.000000e+00> : vector<8x32xf32>
    %2 = tpu.matmul %0, %1, %cst {dimension_numbers = #tpu.dot_dimension_numbers<[1], [0], [0], [1], [0, 0, 1, 1], [], []>} : vector<8x16xf32>, vector<16x32xf32>, vector<8x32xf32> -> vector<8x32xf32>
    %c0_3 = arith.constant 0 : index
    %c0_4 = arith.constant 0 : index
    %3 = vector.load %arg3[%c0_3, %c0_4] : memref<1x32xf32, #tpu.memory_space<vmem>>, vector<1x32xf32>
    %4 = vector.broadcast %3 : vector<1x32xf32> to vector<8x32xf32>
    %5 = arith.addf %2, %4 : vector<8x32xf32>
    %cst_5 = arith.constant 0.000000e+00 : f32
    %6 = vector.broadcast %cst_5 : f32 to vector<8x32xf32>
    %7 = arith.maximumf %5, %6 : vector<8x32xf32>
    %c0_6 = arith.constant 0 : index
    %c0_7 = arith.constant 0 : index
    %8 = vector.load %arg4[%c0_6, %c0_7] : memref<32x128xf32, #tpu.memory_space<vmem>>, vector<32x128xf32>
    %cst_8 = arith.constant dense<0.000000e+00> : vector<8x128xf32>
    %9 = tpu.matmul %7, %8, %cst_8 {dimension_numbers = #tpu.dot_dimension_numbers<[1], [0], [0], [1], [0, 0, 1, 1], [], []>} : vector<8x32xf32>, vector<32x128xf32>, vector<8x128xf32> -> vector<8x128xf32>
    %c0_9 = arith.constant 0 : index
    %c0_10 = arith.constant 0 : index
    %10 = vector.load %arg5[%c0_9, %c0_10] : memref<1x128xf32, #tpu.memory_space<vmem>>, vector<1x128xf32>
    %11 = vector.broadcast %10 : vector<1x128xf32> to vector<8x128xf32>
    %12 = arith.addf %9, %11 : vector<8x128xf32>
    %13 = math.tanh %12 : vector<8x128xf32>
    %c0_11 = arith.constant 0 : index
    %c0_12 = arith.constant 0 : index
    %14 = vector.load %arg6[%c0_11, %c0_12] : memref<8x128xf32, #tpu.memory_space<vmem>>, vector<8x128xf32>
    tpu.vector_store %arg6[%c0_11, %c0_12], %13 {strides = array<i32>} : memref<8x128xf32, #tpu.memory_space<vmem>>, vector<8x128xf32>,
    return
  }
  func.func @transform_0(%arg0: i32) -> (i32, i32) {
    %c0_i32 = arith.constant 0 : i32
    %c0_i32_0 = arith.constant 0 : i32
    return %arg0, %c0_i32 : i32, i32
  }
  func.func @transform_1(%arg0: i32) -> (i32, i32) {
    %c0_i32 = arith.constant 0 : i32
    %c0_i32_0 = arith.constant 0 : i32
    %c0_i32_1 = arith.constant 0 : i32
    return %c0_i32, %c0_i32_0 : i32, i32
  }
  func.func @transform_2(%arg0: i32) -> (i32, i32) {
    %c0_i32 = arith.constant 0 : i32
    %c0_i32_0 = arith.constant 0 : i32
    %c0_i32_1 = arith.constant 0 : i32
    return %c0_i32, %c0_i32_0 : i32, i32
  }
  func.func @transform_3(%arg0: i32) -> (i32, i32) {
    %c0_i32 = arith.constant 0 : i32
    %c0_i32_0 = arith.constant 0 : i32
    %c0_i32_1 = arith.constant 0 : i32
    return %c0_i32, %c0_i32_0 : i32, i32
  }
  func.func @transform_4(%arg0: i32) -> (i32, i32) {
    %c0_i32 = arith.constant 0 : i32
    %c0_i32_0 = arith.constant 0 : i32
    %c0_i32_1 = arith.constant 0 : i32
    return %c0_i32, %c0_i32_0 : i32, i32
  }
  func.func @transform_5(%arg0: i32) -> (i32, i32) {
    %c0_i32 = arith.constant 0 : i32
    %c0_i32_0 = arith.constant 0 : i32
    return %arg0, %c0_i32 : i32, i32
  }
}

</mosaic_0001>

<bundles_post_ra>
// kernel: tpu_custom_call.1
= control target key start
LH: loop header
LB: loop body
LE: loop exit
PB: predicated region body
PF: predicated region fallthrough
CT: control target
= control target key end

     0   :  { %10 = vsyncpa [#allocation3], 0  ;;  %s318_s0 = inlined_call_operand.hbm [shape: f32[8,16], index: 0, kind: input, shape index: {}]   ;;  %s319_s1 = inlined_call_operand.hbm [shape: f32[16,32], index: 1, kind: input, shape index: {}]   ;;  %s320_s2 = inlined_call_operand.vmem [shape: f32[1,32], index: 2, kind: input, shape index: {}]   ;;  %s321_s3 = inlined_call_operand.hbm [shape: f32[32,128], index: 3, kind: input, shape index: {}]   ;;  %s322_s4 = inlined_call_operand.vmem [shape: f32[1,128], index: 4, kind: input, shape index: {}]   ;;  %s323_s5 = inlined_call_operand.hbm [shape: f32[8,128], index: 5, kind: output, shape index: {}]  }
   0x1   :  { %11 = vsyncpa [#allocation6], 0  ;;  %s28_s20 = sshll.u32 %s319_s1, 4  ;;  %s29_s20 = int_to_ptr.hbm [resolvable:$true] %s28_s20 }
   0x2   :  { %12 = vsyncpa [#allocation4], 0  ;;  %s264_s21 = smov [#allocation5]   ;;  %s18_s25 = sshll.u32 %s318_s0, 4  ;;  %s19_s25 = int_to_ptr.hbm [resolvable:$true] %s18_s25 }
   0x3   :  { %s30_s22 = sshll.u32 %s264_s21, 4  ;;  %s265_s26 = smov 128   ;;  %s31_s22 = int_to_ptr.vmem [resolvable:$true] %s30_s22 }
   0x4   :  { %s266_s27 = smov 8   ;;  %s267_s28 = smov [#allocation2]  }
   0x5   :  { %36 = dma.hbm_to_vmem [thread:$0]  %s29_s20, 256, %s31_s22, [#allocation6], %s265_s26, %s265_s26, %s266_s27  }
   0x6   :  { %s20_s29 = sshll.u32 %s267_s28, 4  ;;  %s43_s7 = sshll.u32 %s321_s3, 4  ;;  %s21_s29 = int_to_ptr.vmem [resolvable:$true] %s20_s29  ;;  %s44_s7 = int_to_ptr.hbm [resolvable:$true] %s43_s7 }
   0x7   :  { %23 = dma.hbm_to_vmem [thread:$0]  %s19_s25, 128, %s21_s29, [#allocation3]  }
   0x8   :  { %s268_s1 = smov [#allocation7]  }
   0x9   :  { %s45_s8 = sshll.u32 %s268_s1, 4  ;;  %s46_s8 = int_to_ptr.vmem [resolvable:$true] %s45_s8 }
   0xa   :  { %51 = dma.hbm_to_vmem [thread:$0]  %s44_s7, 512, %s46_s8, [#allocation6], %s265_s26, %s265_s26, %s266_s27  }
   0xb   :  { %258 = dma.done.wait [#allocation3], 128  }
   0xc   :  { %259 = vsyncadd [#allocation3], 4294967168 }
   0xd   :  { %260 = dma.done.wait [#allocation6], 768  }
   0xe   :  { %261 = vsyncadd [#allocation6], 4294966528  ;;  %v68_v0 = vld [vmem:[#allocation5 + $0x8] sm:$0xff]  ;;  %v67_v1 = vld [vmem:[#allocation5] sm:$0xff]  ;;  %vm73_vm0 = vcmask 130048   ;;  %vm106_vm1 = vcmask 261120  }
   0xf   :  { %91 = vmatpush.msra.mxu0 %v68_v0  ;;  %v66_v2 = vld [vmem:[#allocation2] sm:$0xff]  ;;  %v101_v3 = vld [vmem:[#allocation7 + $0x18] sm:$0xff]  ;;  %v100_v4 = vld [vmem:[#allocation7 + $0x10] sm:$0xff]  ;;  %s269_s11 = smov [#allocation8]   ;;  %s139_s15 = sshll.u32 %s323_s5, 4  ;;  %s140_s15 = int_to_ptr.hbm [resolvable:$true] %s139_s15 }
  0x10   :  { %122 = vmatpush.msra.mxu1 %v101_v3  ;;  %v99_v5 = vld [vmem:[#allocation7 + $0x8] sm:$0xff]  ;;  %v98_v6 = vld [vmem:[#allocation7] sm:$0xff]  ;;  %s137_s12 = sshll.u32 %s269_s11, 4  ;;  %s138_s12 = int_to_ptr.vmem [resolvable:$true] %s137_s12 }
  0x11   :  { %92 = vmatpush.msra.mxu0 %v67_v1  ;;  %v158_v7 = vld [vmem:[%s320_s2] ss:$0 sm:$0xff] }
  0x12   :  { %150 = vmatmul.msk.f32.vlgmr.msra.gmra.mxu0 %vm73_vm0, %v66_v2  ;;  %123 = vmatpush.msra.mxu1 %v100_v4  ;;  %v159_v11 = vld [vmem:[%s322_s4] ss:$0 sm:$0xff] }
  0x14   :  { %124 = vmatpush.msra.mxu1 %v99_v5 }
  0x16   :  { %125 = vmatpush.msra.mxu1 %v98_v6 }
  0x8f   :  { %v94_v8 = vpop.f32.mrf.mxu0 }
  0x90   :  { %v95_v9 = vadd.f32 %v158_v7, %v94_v8 }
  0x92   :  { %v97_v10 = vmax.f32 %v95_v9, 0.0 }
  0x94   :  { %151 = vmatmul.msk.f32.vlgmr.msra.gmra.mxu1 %vm106_vm1, %v97_v10 }
 0x111   :  { %v127_v12 = vpop.f32.mrf.mxu1 }
 0x112   :  { %v128_v13 = vadd.f32 %v159_v11, %v127_v12 }
 0x114   :  { %160 = vtanh.f32 %v128_v13 }
 0x11a   :  { %v161_v14 = vpop.eup %160 }
 0x11b   :  { %131 = vst [vmem:[#allocation8] sm:$0xff] %v161_v14 }
 0x11c   :  { %142 = dma.vmem_to_hbm [thread:$0]  %s138_s12, 128, %s140_s15, [#allocation4]  }
 0x11d   :  { %262 = dma.done.wait [#allocation4], 128  }
 0x11e   :  { %263 = vsyncadd [#allocation4], 4294967168 }
 0x11f   :  { %147 = vsyncpa [#allocation3], 1 }
 0x120   :  { %148 = vsyncpa [#allocation6], 1 }
 0x121   :  { %149 = vsyncpa [#allocation4], 1 }

</bundles_post_ra>
